<compile_context>
chip_gen: v6e
topology: v6e:2x2x1
jax: 0.10.0
libtpu: 0.0.40
codegen_flags: <defaults>
</compile_context>

<pallas_src>
import functools

import numpy as np
import jax
import jax.numpy as jnp
from jax.experimental import pallas as pl
from jax.experimental.pallas import tpu as pltpu

_VMEM_LIMIT = 64 * 1024 * 1024
_ROW_CANDS = (512, 448, 416, 392, 384, 352, 336, 320, 288, 256, 224, 192, 160, 128)


def _round_up(x, m):
    return (x + m - 1) // m * m


def _cpad(c):
    """Pad channel counts below 128 up to 128 (dense 128-lane loads/stores)."""
    return max(_round_up(c, 128), 128)


def _pick_rows(m):
    """Row tile tm and padded row count Mp.

    Prefers large tiles (>=128) that divide the (8-aligned) row count so no padding copy is
    needed, and prefers >=2 tiles so the parallel grid axis can feed both v7x TensorCores.
    """
    mp8 = _round_up(max(m, 8), 8)
    if mp8 <= 256:
        return mp8, mp8
    for c in _ROW_CANDS:
        if 2 * c <= mp8 and mp8 % c == 0:
            return c, mp8
    if mp8 <= 512:
        return mp8, mp8
    tm = 512 if mp8 >= 4096 else 256
    return tm, _round_up(mp8, tm)


def _pad_rows(a, mp):
    m = a.shape[0]
    if mp == m:
        return a
    return jnp.zeros((mp,) + a.shape[1:], a.dtype).at[:m].set(a)


# ---------------------------------------------------------------------------
# Kernel 1: matmul with resident weight and fused affine (+residual) (+ReLU)
# ---------------------------------------------------------------------------
def _mm_affine_kernel(*refs, relu, has_res):
    if has_res:
        a_ref, b_ref, s_ref, c_ref, r_ref, o_ref = refs
    else:
        a_ref, b_ref, s_ref, c_ref, o_ref = refs
    y = jnp.dot(a_ref[...], b_ref[...], preferred_element_type=jnp.float32)
    y = y * s_ref[...] + c_ref[...]
    if has_res:
        y = y + r_ref[...].astype(jnp.float32)
    if relu:
        y = jnp.maximum(y, 0.0)
    o_ref[...] = y.astype(o_ref.dtype)


def mm_affine(a, w, scale, bias, *, relu=False, res=None,
              out_dtype=jnp.bfloat16, n_valid=None):
    """maybe_relu((a @ w) * scale + bias [+ res]); per-column scale/bias.

    a: (M, K) activations (cast to bf16), w: (K, Np) bf16 (pre-padded at init),
    scale/bias: (1, Np) f32, res: optional (M, Np) residual added before the ReLU.
    The full weight / scale / bias stay resident in VMEM (index_map constant), so they are
    DMA'd once; the grid is a 1-D parallel sweep over row tiles.
    """
    M, K = a.shape
    Np = w.shape[1]
    tm, Mp = _pick_rows(M)
    a = _pad_rows(a.astype(jnp.bfloat16), Mp)
    inputs = [a, w, scale, bias]
    in_specs = [
        pl.BlockSpec((tm, K), lambda i: (i, 0)),
        pl.BlockSpec((K, Np), lambda i: (0, 0)),      # weight resident in VMEM
        pl.BlockSpec((1, Np), lambda i: (0, 0)),
        pl.BlockSpec((1, Np), lambda i: (0, 0)),
    ]
    if res is not None:
        inputs.append(_pad_rows(res.astype(jnp.bfloat16), Mp))
        in_specs.append(pl.BlockSpec((tm, Np), lambda i: (i, 0)))

    out = pl.pallas_call(
        functools.partial(_mm_affine_kernel, relu=relu, has_res=res is not None),
        out_shape=jax.ShapeDtypeStruct((Mp, Np), out_dtype),
        grid_spec=pltpu.PrefetchScalarGridSpec(
            num_scalar_prefetch=0,
            grid=(Mp // tm,),
            in_specs=in_specs,
            out_specs=pl.BlockSpec((tm, Np), lambda i: (i, 0)),
        ),
        compiler_params=pltpu.CompilerParams(
            dimension_semantics=("parallel",),
            vmem_limit_bytes=_VMEM_LIMIT),
    )(*inputs)
    out = out[:M]
    if n_valid is not None and n_valid != Np:
        out = out[:, :n_valid]
    return out


# ---------------------------------------------------------------------------
# Kernel 2: 3x3 stride-1 (dilated) conv, tap-accumulated, no im2col, no halo copy
# ---------------------------------------------------------------------------
def _conv3x3_kernel(a_hbm, b_ref, s_ref, c_ref, y_ref, x_ref, o_ref,
                    slab_ref, sem, *acc_refs, taps, tm, tk, slab_rows, guard_lo,
                    alloc_rows, m_rows, nk, relu, h, w):
    i = pl.program_id(0)              # M tile (sequential: enables cross-step prefetch)
    k = pl.program_id(1)              # K tile (reduction over cin)
    ni = pl.num_programs(0)
    step = i * nk + k
    slot = step % 2
    last = (i == ni - 1) & (k == nk - 1)

    def start_fetch(ii, kk, ss):
        s0 = jnp.clip(ii * tm - guard_lo, 0, m_rows - slab_rows)
        pltpu.make_async_copy(
            a_hbm.at[pl.ds(s0, slab_rows), pl.ds(kk * tk, tk)],
            slab_ref.at[ss, pl.ds(guard_lo, slab_rows), :],
            sem.at[ss]).start()

    @pl.when(step == 0)
    def _():
        # Zero the halo guard rows once; the DMAs only ever write the middle region, and the
        # spatial-validity masks zero every tap that lands in the guard, so zeros just keep
        # the garbage finite.  Then prime the very first slab (only exposed DMA).
        slab_ref[:, :guard_lo, :] = jnp.zeros((2, guard_lo, tk), jnp.bfloat16)
        if alloc_rows > guard_lo + slab_rows:
            tail = alloc_rows - guard_lo - slab_rows
            slab_ref[:, guard_lo + slab_rows:, :] = jnp.zeros((2, tail, tk), jnp.bfloat16)
        start_fetch(i, k, slot)

    # wait for this step's slab (primed above or prefetched by the previous grid step)
    s0 = jnp.clip(i * tm - guard_lo, 0, m_rows - slab_rows)
    pltpu.make_async_copy(
        a_hbm.at[pl.ds(s0, slab_rows), pl.ds(k * tk, tk)],
        slab_ref.at[slot, pl.ds(guard_lo, slab_rows), :],
        sem.at[slot]).wait()

    # prefetch the next grid step's slab; it overlaps with this step's 9 matmuls
    @pl.when(jnp.logical_not(last))
    def _():
        nxt_i = jnp.where(k + 1 < nk, i, i + 1)
        nxt_k = jnp.where(k + 1 < nk, k + 1, 0)
        start_fetch(nxt_i, nxt_k, 1 - slot)

    base = i * tm + guard_lo - s0     # in-slab row of this tile's zero-offset tap
    yv = y_ref[...]                   # (tm, 1) int32 output-row y coordinate
    xv = x_ref[...]                   # (tm, 1) int32 output-row x coordinate
    part = None
    for t, (off, oy, ox) in enumerate(taps):
        a_t = slab_ref[slot, pl.ds(base + off, tm), :]
        contrib = jnp.dot(a_t, b_ref[t], preferred_element_type=jnp.float32)
        valid = ((yv + oy >= 0) & (yv + oy < h) &
                 (xv + ox >= 0) & (xv + ox < w)).astype(jnp.float32)
        contrib = contrib * valid
        part = contrib if part is None else part + contrib

    def epilogue(acc):
        out = acc * s_ref[...] + c_ref[...]
        if relu:
            out = jnp.maximum(out, 0.0)
        o_ref[...] = out.astype(o_ref.dtype)

    if nk == 1:
        epilogue(part)                # no accumulator scratch needed
    else:
        acc_ref = acc_refs[0]

        @pl.when(k == 0)
        def _():
            acc_ref[...] = part

        @pl.when(k > 0)
        def _():
            acc_ref[...] += part

        @pl.when(k == nk - 1)
        def _():
            epilogue(acc_ref[...])


def conv3x3_tap(x, w9, scale, bias, *, dil, relu=True, out_dtype=jnp.bfloat16):
    """3x3 stride-1 conv with padding == dilation, fused folded-BN affine (+ReLU).

    Tap-decomposed: every tap of the 3x3 kernel is a constant row offset (oy*W + ox) in the
    flattened (N*H*W, Cin) activation.  The unpadded activation stays in HBM; per grid step
    one halo'd, clamped row slab is DMA'd into a guarded double buffer and the 9 taps are
    accumulated as row-shifted, spatially-masked MXU matmuls.
    """
    n, h, w_, cin = x.shape
    cout = w9.shape[-1]
    M = n * h * w_
    tm, Mp = _pick_rows(M)
    ni = Mp // tm
    tk = cin if cin <= 512 else 512
    nk = cin // tk
    R = dil * (w_ + 1)                       # max |row offset| over the 9 taps
    slab_rows = min(tm + 2 * R, M)
    alloc_rows = max(tm + 3 * R, slab_rows + 2 * R + (Mp - M), R + slab_rows)

    a = x.reshape(M, cin).astype(jnp.bfloat16)

    m_idx = jnp.arange(Mp, dtype=jnp.int32)
    rem = m_idx % (h * w_)
    inb = m_idx < M
    yrow = jnp.where(inb, rem // w_, -(10 ** 6)).astype(jnp.int32).reshape(Mp, 1)
    xrow = jnp.where(inb, rem % w_, -(10 ** 6)).astype(jnp.int32).reshape(Mp, 1)

    taps = tuple(((di - 1) * dil * w_ + (dj - 1) * dil, (di - 1) * dil, (dj - 1) * dil)
                 for di in range(3) for dj in range(3))

    scratch = [pltpu.VMEM((2, alloc_rows, tk), jnp.bfloat16),  # guarded double-buffered slab
               pltpu.SemaphoreType.DMA((2,))]
    if nk > 1:
        scratch.append(pltpu.VMEM((tm, cout), jnp.float32))    # f32 accumulator

    out = pl.pallas_call(
        functools.partial(_conv3x3_kernel, taps=taps, tm=tm, tk=tk,
                          slab_rows=slab_rows, guard_lo=R, alloc_rows=alloc_rows,
                          m_rows=M, nk=nk, relu=relu, h=h, w=w_),
        out_shape=jax.ShapeDtypeStruct((Mp, cout), out_dtype),
        grid_spec=pltpu.PrefetchScalarGridSpec(
            num_scalar_prefetch=0,
            grid=(ni, nk),
            in_specs=[
                pl.BlockSpec(memory_space=pl.ANY),                    # flat activation (HBM)
                pl.BlockSpec((9, tk, cout), lambda i, k: (0, k, 0)),  # per-tap weights
                pl.BlockSpec((1, cout), lambda i, k: (0, 0)),         # folded-BN scale
                pl.BlockSpec((1, cout), lambda i, k: (0, 0)),         # folded-BN bias
                pl.BlockSpec((tm, 1), lambda i, k: (i, 0)),           # y coord per row
                pl.BlockSpec((tm, 1), lambda i, k: (i, 0)),           # x coord per row
            ],
            out_specs=pl.BlockSpec((tm, cout), lambda i, k: (i, 0)),
            scratch_shapes=scratch),
        compiler_params=pltpu.CompilerParams(
            # TODO(synk): cross-grid-step slab prefetch needs sequential M tiles, so the 3x3
            # convs forgo v7x megacore splitting (the 1x1 matmuls keep a parallel M axis).
            dimension_semantics=("arbitrary", "arbitrary"),
            vmem_limit_bytes=_VMEM_LIMIT),
    )(a, w9, scale, bias, yrow, xrow)
    return out[:M].reshape(n, h, w_, cout)


# ---------------------------------------------------------------------------
# Stem max-pool (tiled VPU max over the 9 window taps)
# ---------------------------------------------------------------------------
def _max9_kernel(*refs):
    o_ref = refs[-1]
    r = refs[0][...]
    for ref in refs[1:-1]:
        r = jnp.maximum(r, ref[...])
    o_ref[...] = r


def maxpool_3x3_s2_p1(x):
    # TODO(synk): the 9 shifted window views are still gathered JAX-side (one small H/2 map);
    # only the max-reduction runs in Pallas.
    n, h, w_, c = x.shape
    ho = (h + 2 - 3) // 2 + 1
    wo = (w_ + 2 - 3) // 2 + 1
    xp = jnp.pad(x, ((0, 0), (1, 1), (1, 1), (0, 0)), constant_values=-jnp.inf)
    M = n * ho * wo
    tm, Mp = _pick_rows(M)
    wins = [_pad_rows(xp[:, di:di + 2 * ho:2, dj:dj + 2 * wo:2, :].reshape(M, c), Mp)
            for di in range(3) for dj in range(3)]
    out = pl.pallas_call(
        _max9_kernel,
        out_shape=jax.ShapeDtypeStruct((Mp, c), x.dtype),
        grid_spec=pltpu.PrefetchScalarGridSpec(
            num_scalar_prefetch=0,
            grid=(Mp // tm,),
            in_specs=[pl.BlockSpec((tm, c), lambda i: (i, 0))] * 9,
            out_specs=pl.BlockSpec((tm, c), lambda i: (i, 0)),
        ),
        compiler_params=pltpu.CompilerParams(
            dimension_semantics=("parallel",),
            vmem_limit_bytes=_VMEM_LIMIT),
    )(*wins)
    return out[:M].reshape(n, ho, wo, c)


# ---------------------------------------------------------------------------
# Bilinear upsample (align_corners=False) as two MXU matmuls, landing in NCHW
# ---------------------------------------------------------------------------
def _bilinear_coords(out_size, in_size):
    scale = in_size / out_size
    i = np.arange(out_size, dtype=np.float64)
    src = np.maximum((i + 0.5) * scale - 0.5, 0.0)
    i0 = np.minimum(np.floor(src).astype(np.int64), in_size - 1)
    i1 = np.minimum(i0 + 1, in_size - 1)
    frac = (src - i0).astype(np.float32)
    return i0, i1, frac


def _interp_matrix(in_size, out_size):
    # Sparse (in, out) matrix of F.interpolate(mode='bilinear', align_corners=False) weights;
    # the separable upsample then becomes two matmuls and the second lands directly in NCHW.
    i0, i1, frac = _bilinear_coords(out_size, in_size)
    m = np.zeros((in_size, out_size), np.float32)
    cols = np.arange(out_size)
    m[i0, cols] += 1.0 - frac
    m[i1, cols] += frac
    return jnp.asarray(m, jnp.bfloat16)


def bilinear_upsample_to_nchw(logits_nhwc, out_h, out_w):
    n, h, w_, c = logits_nhwc.shape
    # pass 1: interpolate along H   ((n, w, c, h) @ (h, out_h))
    t = jnp.transpose(logits_nhwc, (0, 2, 3, 1)).reshape(n * w_ * c, h)
    t = mm_affine(t, _interp_matrix(h, out_h),
                  jnp.ones((1, out_h), jnp.float32),
                  jnp.zeros((1, out_h), jnp.float32),
                  relu=False, out_dtype=jnp.bfloat16)
    t = t.reshape(n, w_, c, out_h)
    # pass 2: interpolate along W   ((n, c, out_h, w) @ (w, out_w)) -> (N, C, H, W) = NCHW
    t = jnp.transpose(t, (0, 2, 3, 1)).reshape(n * c * out_h, w_)
    out = mm_affine(t, _interp_matrix(w_, out_w),
                    jnp.ones((1, out_w), jnp.float32),
                    jnp.zeros((1, out_w), jnp.float32),
                    relu=False, out_dtype=jnp.float32)
    return out.reshape(n, c, out_h, out_w)


# ---------------------------------------------------------------------------
# im2col fallback (7x7 stem and the single stride-2 3x3 conv only)
# ---------------------------------------------------------------------------
def conv2d_im2col(x, p, *, kh, kw, stride, padding, dilation, relu):
    # TODO(synk): these two strided convs still build im2col patches JAX-side.
    n, h, w_, cin = x.shape
    ho = (h + 2 * padding - dilation * (kh - 1) - 1) // stride + 1
    wo = (w_ + 2 * padding - dilation * (kw - 1) - 1) // stride + 1
    xp = jnp.pad(x, ((0, 0), (padding, padding), (padding, padding), (0, 0)))
    patches = [xp[:, di * dilation: di * dilation + stride * ho: stride,
                  dj * dilation: dj * dilation + stride * wo: stride, :]
               for di in range(kh) for dj in range(kw)]
    pat = jnp.concatenate(patches, axis=-1).reshape(n * ho * wo, kh * kw * cin)
    y = mm_affine(pat, p["w"], p["scale"], p["bias"], relu=relu)
    return y.reshape(n, ho, wo, y.shape[-1])


# ---------------------------------------------------------------------------
# Deterministic synthetic parameters (fcn_resnet101 backbone + FCNHead(2048, 23))
# Weights are pre-formatted / pre-padded (both K and N padded to >=128 lanes) at init.
# ---------------------------------------------------------------------------
def _he_conv(key, kh, kw, cin, cout):
    return (jax.random.normal(key, (kh, kw, cin, cout), jnp.float32)
            * np.sqrt(2.0 / (kh * kw * cin)))


def _bn_affine(key, cout):
    ks = jax.random.split(key, 4)
    gamma = 1.0 + 0.1 * jax.random.normal(ks[0], (cout,), jnp.float32)
    beta = 0.1 * jax.random.normal(ks[1], (cout,), jnp.float32)
    mean = 0.1 * jax.random.normal(ks[2], (cout,), jnp.float32)
    var = 0.9 + 0.1 * jnp.abs(jax.random.normal(ks[3], (cout,), jnp.float32))
    scale = gamma / jnp.sqrt(var + 1e-5)     # eval-mode BN folded to affine
    bias = beta - mean * scale
    return scale, bias


def _pack_mm(w, scale, bias, cin_pad=None, cout_pad=None):
    kh, kw, cin, cout = w.shape
    cin_p = cin_pad or cin
    cout_p = cout_pad or cout
    wp = jnp.zeros((kh, kw, cin_p, cout_p), jnp.float32).at[:, :, :cin, :cout].set(w)
    wm = wp.reshape(kh * kw * cin_p, cout_p).astype(jnp.bfloat16)
    s = jnp.zeros((1, cout_p), jnp.float32).at[0, :cout].set(scale)
    b = jnp.zeros((1, cout_p), jnp.float32).at[0, :cout].set(bias)
    return {"w": wm, "scale": s, "bias": b, "nout": cout}


def init_conv_bn_mm(key, idx, kh, kw, cin, cout, cin_pad=None, cout_pad=None):
    ks = jax.random.split(jax.random.fold_in(key, idx), 2)
    w = _he_conv(ks[0], kh, kw, cin, cout)
    scale, bias = _bn_affine(ks[1], cout)
    return _pack_mm(w, scale, bias, cin_pad, cout_pad)


def init_conv_bn_tap(key, idx, cin, cout, cin_pad=None, cout_pad=None):
    ks = jax.random.split(jax.random.fold_in(key, idx), 2)
    w = _he_conv(ks[0], 3, 3, cin, cout)
    scale, bias = _bn_affine(ks[1], cout)
    cin_p = cin_pad or cin
    cout_p = cout_pad or cout
    wp = jnp.zeros((3, 3, cin_p, cout_p), jnp.float32).at[:, :, :cin, :cout].set(w)
    return {"w9": wp.reshape(9, cin_p, cout_p).astype(jnp.bfloat16),
            "scale": jnp.zeros((1, cout_p), jnp.float32).at[0, :cout].set(scale),
            "bias": jnp.zeros((1, cout_p), jnp.float32).at[0, :cout].set(bias)}


def init_conv_bias_mm(key, idx, kh, kw, cin, cout, cin_pad=None, cout_pad=None):
    ks = jax.random.split(jax.random.fold_in(key, idx), 2)
    w = _he_conv(ks[0], kh, kw, cin, cout)
    b = 0.01 * jax.random.normal(ks[1], (cout,), jnp.float32)
    return _pack_mm(w, jnp.ones((cout,), jnp.float32), b, cin_pad, cout_pad)


def build_params(key, num_classes=23):
    idx = [0]

    def nxt():
        idx[0] += 1
        return idx[0]

    # TODO(synk): pretrained torchvision fcn_resnet101 weights cannot be loaded here;
    # deterministic He init is used instead (architecture / shapes are faithful).
    params = {"num_classes": num_classes,
              "stem": init_conv_bn_mm(key, nxt(), 7, 7, 3, 64, cout_pad=_cpad(64))}
    # ResNet-101 with replace_stride_with_dilation=[False, True, True] (output stride 8)
    layer_cfg = [
        # (planes, num_blocks, stride, dilation_first_block, dilation_rest)
        (64, 3, 1, 1, 1),
        (128, 4, 2, 1, 1),
        (256, 23, 1, 1, 2),
        (512, 3, 1, 2, 4),
    ]
    inplanes = 64
    layers = []
    for planes, nblocks, stride, d_first, d_rest in layer_cfg:
        blocks = []
        for b in range(nblocks):
            s = stride if b == 0 else 1
            d = d_first if b == 0 else d_rest
            cin = inplanes if b == 0 else planes * 4
            cin_p, mid_p, out_p = _cpad(cin), _cpad(planes), _cpad(planes * 4)
            blk = {
                "conv1": init_conv_bn_mm(key, nxt(), 1, 1, cin, planes,
                                         cin_pad=cin_p, cout_pad=mid_p),
                "conv3": init_conv_bn_mm(key, nxt(), 1, 1, planes, planes * 4,
                                         cin_pad=mid_p, cout_pad=out_p),
                "stride": s,
                "dilation": d,
            }
            if s == 1:  # tap-decomposed Pallas conv (padding == dilation)
                blk["conv2"] = init_conv_bn_tap(key, nxt(), planes, planes,
                                                cin_pad=mid_p, cout_pad=mid_p)
            else:       # the single stride-2 3x3 -> im2col + mm
                blk["conv2"] = init_conv_bn_mm(key, nxt(), 3, 3, planes, planes,
                                               cin_pad=mid_p, cout_pad=mid_p)
            if b == 0:  # projection shortcut
                blk["ds"] = init_conv_bn_mm(key, nxt(), 1, 1, cin, planes * 4,
                                            cin_pad=cin_p, cout_pad=out_p)
            blocks.append(blk)
        layers.append(blocks)
        inplanes = planes * 4
    params["layers"] = layers
    # FCNHead(2048, nc): Conv3x3(2048->512, no bias)+BN+ReLU+Dropout+Conv1x1(512->nc)
    params["head_conv"] = init_conv_bn_tap(key, nxt(), 2048, 512)
    params["head_out"] = init_conv_bias_mm(key, nxt(), 1, 1, 512, num_classes,
                                           cout_pad=_cpad(num_classes))
    return params


# ---------------------------------------------------------------------------
# Forward pass (== SegmentationNN.forward: self.fcn(x)['out'])
# ---------------------------------------------------------------------------
def bottleneck(x, blk):
    n, h, w_, cin = x.shape
    p1, p2, p3 = blk["conv1"], blk["conv2"], blk["conv3"]
    out = mm_affine(x.reshape(-1, cin), p1["w"], p1["scale"], p1["bias"], relu=True)
    out = out.reshape(n, h, w_, out.shape[-1])
    if blk["stride"] == 1:
        out = conv3x3_tap(out, p2["w9"], p2["scale"], p2["bias"],
                          dil=blk["dilation"], relu=True)
    else:
        out = conv2d_im2col(out, p2, kh=3, kw=3, stride=blk["stride"],
                            padding=blk["dilation"], dilation=blk["dilation"],
                            relu=True)
    _, ho, wo, cmid = out.shape
    if "ds" in blk:
        xs = x if blk["stride"] == 1 else x[:, ::blk["stride"], ::blk["stride"], :]
        pd = blk["ds"]
        identity = mm_affine(xs.reshape(-1, cin), pd["w"], pd["scale"], pd["bias"],
                             relu=False)
    else:
        identity = x.reshape(-1, cin)
    # conv3 with residual add + ReLU fused into the matmul epilogue
    y = mm_affine(out.reshape(-1, cmid), p3["w"], p3["scale"], p3["bias"],
                  relu=True, res=identity)
    return y.reshape(n, ho, wo, y.shape[-1])


def segmentation_nn_forward(x_nchw, params):
    n, c, h, w = x_nchw.shape
    x = jnp.transpose(x_nchw, (0, 2, 3, 1)).astype(jnp.bfloat16)  # NCHW -> NHWC, bf16
    x = conv2d_im2col(x, params["stem"], kh=7, kw=7, stride=2, padding=3,
                      dilation=1, relu=True)
    x = maxpool_3x3_s2_p1(x)
    for blocks in params["layers"]:
        for blk in blocks:
            x = bottleneck(x, blk)
    ph = params["head_conv"]
    x = conv3x3_tap(x, ph["w9"], ph["scale"], ph["bias"], dil=1, relu=True)
    # TODO(synk): nn.Dropout(0.1) in FCNHead is identity under eval-mode semantics.
    po = params["head_out"]
    nn_, hh, ww, cc = x.shape
    nc = params["num_classes"]
    logits = mm_affine(x.reshape(-1, cc), po["w"], po["scale"], po["bias"],
                       relu=False, out_dtype=jnp.bfloat16, n_valid=nc)
    logits = logits.reshape(nn_, hh, ww, nc)
    # FCN wrapper: F.interpolate(x, size=input_shape, mode='bilinear', align_corners=False),
    # fused with the NHWC->NCHW transpose.
    return bilinear_upsample_to_nchw(logits, h, w)


if __name__ == "__main__":
    key = jax.random.PRNGKey(0)
    params = build_params(jax.random.fold_in(key, 1), num_classes=23)
    x = jax.random.normal(jax.random.fold_in(key, 2), (2, 3, 32, 32), jnp.float32)
    out = segmentation_nn_forward(x, params)
    out = jax.block_until_ready(out)
    assert out.shape == (2, 23, 32, 32), out.shape
    assert bool(jnp.all(jnp.isfinite(out)))
    print("KERNEL_OK")
</pallas_src>

<mosaic_0001>
module attributes {stable_mosaic.version = 11 : i64} {
  func.func @_mm_affine_kernel(%arg0: i32, %arg1: memref<256x147xbf16, #tpu.memory_space<vmem>>, %arg2: memref<147x128xbf16, #tpu.memory_space<vmem>>, %arg3: memref<1x128xf32, #tpu.memory_space<vmem>>, %arg4: memref<1x128xf32, #tpu.memory_space<vmem>>, %arg5: memref<256x128xbf16, #tpu.memory_space<vmem>>) attributes {dimension_semantics = [#tpu.dimension_semantics<parallel>], iteration_bounds = array<i64: 2>, scalar_prefetch = 0 : i64, scratch_operands = 0 : i64, tpu.core_type = #tpu.core_type<tc>, window_params = [{transform_indices = @transform_0, window_bounds = array<i64: 256, 147>}, {pipeline_mode = #tpu.pipeline_mode<synchronous>, transform_indices = @transform_1, window_bounds = array<i64: 147, 128>}, {pipeline_mode = #tpu.pipeline_mode<synchronous>, transform_indices = @transform_2, window_bounds = array<i64: 1, 128>}, {pipeline_mode = #tpu.pipeline_mode<synchronous>, transform_indices = @transform_3, window_bounds = array<i64: 1, 128>}, {transform_indices = @transform_4, window_bounds = array<i64: 256, 128>}]} {
    %c0 = arith.constant 0 : index
    %c0_0 = arith.constant 0 : index
    %0 = vector.load %arg1[%c0, %c0_0] : memref<256x147xbf16, #tpu.memory_space<vmem>>, vector<256x147xbf16>
    %c0_1 = arith.constant 0 : index
    %c0_2 = arith.constant 0 : index
    %1 = vector.load %arg2[%c0_1, %c0_2] : memref<147x128xbf16, #tpu.memory_space<vmem>>, vector<147x128xbf16>
    %cst = arith.constant dense<0.000000e+00> : vector<256x128xf32>
    %2 = tpu.matmul %0, %1, %cst {dimension_numbers = #tpu.dot_dimension_numbers<[1], [0], [0], [1], [0, 0, 1, 1], [], []>} : vector<256x147xbf16>, vector<147x128xbf16>, vector<256x128xf32> -> vector<256x128xf32>
    %c0_3 = arith.constant 0 : index
    %c0_4 = arith.constant 0 : index
    %3 = vector.load %arg3[%c0_3, %c0_4] : memref<1x128xf32, #tpu.memory_space<vmem>>, vector<1x128xf32>
    %4 = vector.broadcast %3 : vector<1x128xf32> to vector<256x128xf32>
    %5 = arith.mulf %2, %4 : vector<256x128xf32>
    %c0_5 = arith.constant 0 : index
    %c0_6 = arith.constant 0 : index
    %6 = vector.load %arg4[%c0_5, %c0_6] : memref<1x128xf32, #tpu.memory_space<vmem>>, vector<1x128xf32>
    %7 = vector.broadcast %6 : vector<1x128xf32> to vector<256x128xf32>
    %8 = arith.addf %5, %7 : vector<256x128xf32>
    %cst_7 = arith.constant 0.000000e+00 : f32
    %9 = vector.broadcast %cst_7 : f32 to vector<256x128xf32>
    %10 = arith.maximumf %8, %9 : vector<256x128xf32>
    %11 = arith.truncf %10 : vector<256x128xf32> to vector<256x128xbf16>
    %c0_8 = arith.constant 0 : index
    %c0_9 = arith.constant 0 : index
    %12 = vector.load %arg5[%c0_8, %c0_9] : memref<256x128xbf16, #tpu.memory_space<vmem>>, vector<256x128xbf16>
    tpu.vector_store %arg5[%c0_8, %c0_9], %11 {strides = array<i32>} : memref<256x128xbf16, #tpu.memory_space<vmem>>, vector<256x128xbf16>,
    return
  }
  func.func @transform_0(%arg0: i32) -> (i32, i32) {
    %c0_i32 = arith.constant 0 : i32
    %c0_i32_0 = arith.constant 0 : i32
    return %arg0, %c0_i32 : i32, i32
  }
  func.func @transform_1(%arg0: i32) -> (i32, i32) {
    %c0_i32 = arith.constant 0 : i32
    %c0_i32_0 = arith.constant 0 : i32
    %c0_i32_1 = arith.constant 0 : i32
    return %c0_i32, %c0_i32_0 : i32, i32
  }
  func.func @transform_2(%arg0: i32) -> (i32, i32) {
    %c0_i32 = arith.constant 0 : i32
    %c0_i32_0 = arith.constant 0 : i32
    %c0_i32_1 = arith.constant 0 : i32
    return %c0_i32, %c0_i32_0 : i32, i32
  }
  func.func @transform_3(%arg0: i32) -> (i32, i32) {
    %c0_i32 = arith.constant 0 : i32
    %c0_i32_0 = arith.constant 0 : i32
    %c0_i32_1 = arith.constant 0 : i32
    return %c0_i32, %c0_i32_0 : i32, i32
  }
  func.func @transform_4(%arg0: i32) -> (i32, i32) {
    %c0_i32 = arith.constant 0 : i32
    %c0_i32_0 = arith.constant 0 : i32
    return %arg0, %c0_i32 : i32, i32
  }
}

</mosaic_0001>

<bundles_post_ra>
// kernel: tpu_custom_call.1
= control target key start
LH: loop header
LB: loop body
LE: loop exit
PB: predicated region body
PF: predicated region fallthrough
CT: control target
= control target key end

     0   :  { %9 = vsyncpa [#allocation3], 0  ;;  %s1743_s0 = inlined_call_operand.vmem [shape: bf16[512,147], index: 0, kind: input, shape index: {}]   ;;  %s1744_s1 = inlined_call_operand.vmem [shape: bf16[147,128], index: 1, kind: input, shape index: {}]   ;;  %s1745_s2 = inlined_call_operand.vmem [shape: f32[1,128], index: 2, kind: input, shape index: {}]   ;;  %s1746_s3 = inlined_call_operand.vmem [shape: f32[1,128], index: 3, kind: input, shape index: {}]   ;;  %s1747_s4 = inlined_call_operand.hbm [shape: bf16[512,128], index: 4, kind: output, shape index: {}]  }
   0x1   :  { %11 = vsyncpa [#allocation3 + $0x1], 0  ;;  %s1465_s15 = smov 0   ;;  %s1467_s16 = smov 0  }
   0x2   :  { %s1469_s17 = smov 0   ;;  %s1471_s18 = smov 0  }
   0x3 LB: > { %s1486_s19 = sadd.s32 4294967295, %s1433_s18   ;;  %s1018_s20 = sadd.s32 4294967294, %s1433_s18   ;;  %s1433_s18 = sphi %s1471_s18, %s1753_s18   ;;  %s1429_s17 = sphi %s1469_s17, %s1752_s17   ;;  %s1425_s16 = sphi %s1467_s16, %s1751_s16   ;;  %s1421_s15 = sphi %s1465_s15, %s1750_s15  }
   0x4   : > { %s1490_s21 = sadd.s32 1, %s1433_s18   ;;  %s113_s22 = sadd.s32 1, %s1429_s17 }
   0x5   : > { %s110_s23 = ssub.s32 %s1433_s18, %s1490_s21  ;;  %p123_p0 = scmp.ne.s32.totalorder %s1429_s17, %s1425_s16 }
   0x6   : > { %p111_p1 = scmp.eq.s32.totalorder %s110_s23, 0  ;;  %p124_p2 = scmp.eq.s32.totalorder %s1486_s19, 1 }
   0x7   : > { %p129_p3 = scmp.ne.s32.totalorder %s1425_s16, %s1421_s15  ;;  %p130_p4 = scmp.eq.s32.totalorder %s1018_s20, 1 }
   0x8   : > { %s1501_s24 = scalar_select %p111_p1, %s1429_s17, %s113_s22  }
   0x9   : > { %p1503_p5 = por %p124_p2, %p123_p0  ;;  %p1507_p6 = por %p130_p4, %p129_p3 }
   0xa   : > { %p1021_p7 = scmp.ge.s32.totalorder %s1433_s18, 1  ;;  %p167_p8 = scmp.lt.s32.totalorder %s1433_s18, 3 }
   0xc   : > { %p168_p9 = pnand %p1021_p7, %p167_p8 }
   0xd   : > { %s1023_s7 = sshll.u32 (!%p168_p9), %s1486_s19, 5  ;;  %s1156_s22 = sshll.u32 (!%p168_p9), %s1486_s19, 11 }
   0xe   : > { %171 = sbr.rel (%p168_p9) target bundleno = 335 (0x14f), region = 36  ;;  %p195_p10 = scmp.lt.s32.totalorder (!%p168_p9), %s1023_s7, 63 }
   0xf   : > { %s1695_s29 = scalar_lea.hbm (!%p168_p9), %s1747_s4, %s1156_s22  ;;  %s1437_s5 = smov (!%p168_p9), [#allocation2]  }
  0x10   : > { %s1377_s6 = sshll.u32 (!%p168_p9), %s1437_s5, 4  ;;  %s1378_s6 = int_to_ptr.vmem [resolvable:$false] %s1377_s6 }
  0x13   : > { %v1315_v0 = vld [vmem:[%s1744_s1 + $0x38] sm:$0xff]   ;;  %v1435_v1 = vmov 0   ;;  %v1316_v2 = vld [vmem:[%s1744_s1 + $0x30] sm:$0xff]   ;;  %v1317_v3 = vld [vmem:[%s1744_s1 + $0x28] sm:$0xff]   ;;  %s1755_s7 = smov (!%p195_p10, %s1023_s7), 63  ;;  %vm455_vm0 = vcmask 154624  }
  0x14   : > { %511 = vmatprep.subr.bf16.mxu0 %v1435_v1  ;;  %1252 = vmatprep.subr.bf16.mxu1 %v1435_v1  ;;  %v1318_v4 = vld [vmem:[%s1744_s1 + $0x20] sm:$0xff]   ;;  %s1123_s10 = sshll.u32 %s1755_s7, 3  ;;  %v1319_v5 = vld [vmem:[%s1744_s1 + $0x18] sm:$0xff]   ;;  %v1320_v8 = vld [vmem:[%s1744_s1 + $0x10] sm:$0xff]   ;;  %vm504_vm1 = vcmask 1040384   ;;  %vm505_vm2 = vcmask 1041408  }
  0x15   : > { %512 = vmatpush1.bf16.msra.mxu0 %v1315_v0  ;;  %1262 = vmatpush1.bf16.msra.mxu1 %v1315_v0  ;;  %s1529_s13 = scalar_lea.vmem %s1743_s0, %s1123_s10  ;;  %v1321_v9 = vld [vmem:[%s1744_s1 + $0x8] sm:$0xff]   ;;  %v1436_v10 = vmov 65535   ;;  %v1322_v12 = vld [vmem:[%s1744_s1] sm:$0xff]   ;;  %s1379_s7 = scalar_lea.vmem %s1378_s6, 4096 }
  0x16   : > { %513 = vmatprep.subr.bf16.mxu0 %v1435_v1  ;;  %1253 = vmatprep.subr.bf16.mxu1 %v1435_v1  ;;  %v1327_v6 = vld [vmem:[%s1529_s13 + $0x4] ss:$8 sps:$4 sm:$0xff]   ;;  %v506_v11 = vsel %vm504_vm1, 4294967295, %v1436_v10  ;;  %v1323_v13 = vld [vmem:[%s1744_s1 + $0x48] ss:$0 sps:$4 sm:$0x33]  }
  0x17   : > { %v1330_v7 = vld [vmem:[%s1529_s13 + $0x84] ss:$8 sps:$4 sm:$0xff]   ;;  %1068 = vmatprep.mubr.msk.bf16.mxu0 %vm455_vm0, %v1327_v6  ;;  %v507_v14 = vsel %vm505_vm2, %v506_v11, 0  ;;  %v1325_v17 = vld [vmem:[%s1529_s13] ss:$8 sps:$4 sm:$0xff]  }
  0x18   : > { %1076 = vmatprep.mubr.msk.bf16.mxu1 %vm455_vm0, %v1330_v7  ;;  %v509_v15 = vand.u32 %v1323_v13, %v507_v14  ;;  %v1324_v16 = vld [vmem:[%s1744_s1 + $0x40] sm:$0xff]   ;;  %v1331_v19 = vld [vmem:[%s1529_s13 + $0x14] ss:$8 sps:$4 sm:$0xff]   ;;  %v1335_v21 = vld [vmem:[%s1529_s13 + $0x10] ss:$8 sps:$4 sm:$0xff]  }
  0x19   : > { %514 = vmatpush1.bf16.msra.mxu0 %v1316_v2  ;;  %1263 = vmatpush1.bf16.msra.mxu1 %v1316_v2  ;;  %v1328_v18 = vld [vmem:[%s1529_s13 + $0x80] ss:$8 sps:$4 sm:$0xff]   ;;  %v1333_v20 = vld [vmem:[%s1529_s13 + $0x94] ss:$8 sps:$4 sm:$0xff]   ;;  %v1336_v22 = vld [vmem:[%s1529_s13 + $0x90] ss:$8 sps:$4 sm:$0xff]  }
  0x1a   : > { %515 = vmatprep.subr.bf16.mxu0 %v1435_v1  ;;  %1254 = vmatprep.subr.bf16.mxu1 %v1435_v1  ;;  %v1337_v23 = vld [vmem:[%s1529_s13 + $0x24] ss:$8 sps:$4 sm:$0xff]   ;;  %v1341_v25 = vld [vmem:[%s1529_s13 + $0x20] ss:$8 sps:$4 sm:$0xff]   ;;  %v1343_v27 = vld [vmem:[%s1529_s13 + $0x34] ss:$8 sps:$4 sm:$0xff]  }
  0x1b   : > { %v1339_v24 = vld [vmem:[%s1529_s13 + $0xa4] ss:$8 sps:$4 sm:$0xff]   ;;  %v1342_v26 = vld [vmem:[%s1529_s13 + $0xa0] ss:$8 sps:$4 sm:$0xff]   ;;  %v1345_v28 = vld [vmem:[%s1529_s13 + $0xb4] ss:$8 sps:$4 sm:$0xff]  }
  0x1c   : > { %v1347_v29 = vld [vmem:[%s1529_s13 + $0x30] ss:$8 sps:$4 sm:$0xff]   ;;  %v1349_v31 = vld [vmem:[%s1529_s13 + $0x44] ss:$8 sps:$4 sm:$0xff]   ;;  %v1353_v33 = vld [vmem:[%s1529_s13 + $0x40] ss:$8 sps:$4 sm:$0xff]  }
  0x1d   : > { %516 = vmatpush1.bf16.msra.mxu0 %v1317_v3  ;;  %1264 = vmatpush1.bf16.msra.mxu1 %v1317_v3  ;;  %v1348_v30 = vld [vmem:[%s1529_s13 + $0xb0] ss:$8 sps:$4 sm:$0xff]   ;;  %v1351_v32 = vld [vmem:[%s1529_s13 + $0xc4] ss:$8 sps:$4 sm:$0xff]   ;;  %v1354_v34 = vld [vmem:[%s1529_s13 + $0xc0] ss:$8 sps:$4 sm:$0xff]  }
  0x1e   : > { %517 = vmatprep.subr.bf16.mxu0 %v1435_v1  ;;  %1255 = vmatprep.subr.bf16.mxu1 %v1435_v1  ;;  %v1355_v35 = vld [vmem:[%s1529_s13 + $0x54] ss:$8 sps:$4 sm:$0xff]   ;;  %v1359_v37 = vld [vmem:[%s1529_s13 + $0x50] ss:$8 sps:$4 sm:$0xff]   ;;  %v1361_v39 = vld [vmem:[%s1529_s13 + $0x64] ss:$8 sps:$4 sm:$0xff]  }
  0x1f   : > { %v1357_v36 = vld [vmem:[%s1529_s13 + $0xd4] ss:$8 sps:$4 sm:$0xff]   ;;  %v1360_v38 = vld [vmem:[%s1529_s13 + $0xd0] ss:$8 sps:$4 sm:$0xff]   ;;  %v1363_v40 = vld [vmem:[%s1529_s13 + $0xe4] ss:$8 sps:$4 sm:$0xff]  }
  0x20   : > { %v1365_v41 = vld [vmem:[%s1529_s13 + $0x60] ss:$8 sps:$4 sm:$0xff]   ;;  %v1367_v43 = vld [vmem:[%s1529_s13 + $0x74] ss:$8 sps:$4 sm:$0xff]   ;;  %v1371_v45 = vld [vmem:[%s1529_s13 + $0x70] ss:$8 sps:$4 sm:$0xff]  }
  0x21   : > { %518 = vmatpush1.bf16.msra.mxu0 %v1318_v4  ;;  %1265 = vmatpush1.bf16.msra.mxu1 %v1318_v4  ;;  %v1366_v42 = vld [vmem:[%s1529_s13 + $0xe0] ss:$8 sps:$4 sm:$0xff]   ;;  %v1369_v44 = vld [vmem:[%s1529_s13 + $0xf4] ss:$8 sps:$4 sm:$0xff]   ;;  %v1372_v46 = vld [vmem:[%s1529_s13 + $0xf0] ss:$8 sps:$4 sm:$0xff]  }
  0x22   : > { %519 = vmatprep.subr.bf16.mxu0 %v1435_v1  ;;  %1256 = vmatprep.subr.bf16.mxu1 %v1435_v1  ;;  %v1600_v47 = vld [vmem:[%s1745_s2] ss:$0 sm:$0xff]  ;;  %s191_s13 = sand.u32 1, %s1425_s16  }
  0x23   : > { %v1606_v51 = vld [vmem:[%s1746_s3] ss:$0 sm:$0xff]  ;;  %s1022_s14 = sshll.u32 %s191_s13, 7  ;;  %s1703_s19 = scalar_lea.sflag [#allocation3], %s191_s13 }
  0x24   : > { %s1622_s20 = scalar_lea.vmem [#allocation2], %s1022_s14 }
  0x25   : > { %520 = vmatpush1.bf16.msra.mxu0 %v1319_v5  ;;  %1266 = vmatpush1.bf16.msra.mxu1 %v1319_v5  ;;  %s956_s23 = sshll.u32 %s1622_s20, 4  ;;  %s1697_s23 = int_to_ptr.vmem [resolvable:$true] %s956_s23 }
  0x26   : > { %521 = vmatprep.subr.bf16.mxu0 %v1435_v1  ;;  %1257 = vmatprep.subr.bf16.mxu1 %v1435_v1  ;;  %s1373_s30 = scalar_lea.vmem %s1697_s23, 2048  ;;  %p1380_p0 = scmp.lt.s32.totalorder %s1697_s23, %s1378_s6 }
  0x27   : > { %p1374_p11 = scmp.ne.s32.totalorder %s1697_s23, %s1373_s30  ;;  %p1381_p1 = scmp.lt.s32.totalorder %s1379_s7, %s1373_s30 }
  0x29   : > { %522 = vmatpush1.bf16.msra.mxu0 %v1320_v8  ;;  %1267 = vmatpush1.bf16.msra.mxu1 %v1320_v8  ;;  %p1375_p12 = pnand %p1374_p11, %p1503_p5  ;;  %p1382_p2 = por %p1381_p1, %p1380_p0 }
  0x2a   : > { %523 = vmatprep.subr.bf16.mxu0 %v1435_v1  ;;  %1258 = vmatprep.subr.bf16.mxu1 %v1435_v1 }
  0x2b   : > { %p1376_p13 = pneg %p1375_p12 }
  0x2d   : > { %524 = vmatpush1.bf16.msra.mxu0 %v1321_v9  ;;  %1268 = vmatpush1.bf16.msra.mxu1 %v1321_v9  ;;  %p1383_p3 = pnand %p1382_p2, %p1376_p13 }
  0x2e   : > { %525 = vmatprep.subr.bf16.mxu0 %v1435_v1  ;;  %1259 = vmatprep.subr.bf16.mxu1 %v1435_v1 }
  0x31   : > { %526 = vmatpush1.bf16.msra.mxu0 %v1322_v12  ;;  %1269 = vmatpush1.bf16.msra.mxu1 %v1322_v12 }
  0x32   : > { %539 = vmatprep.subr.bf16.mxu0 %v1435_v1  ;;  %1260 = vmatprep.subr.bf16.mxu1 %v1435_v1 }
  0x35   : > { %540 = vmatpush2.bf16.msra.mxu0 %v509_v15  ;;  %1270 = vmatpush2.bf16.msra.mxu1 %v509_v15 }
  0x36   : > { %541 = vmatprep.subr.bf16.mxu0 %v1435_v1  ;;  %1261 = vmatprep.subr.bf16.mxu1 %v1435_v1 }
  0x39   : > { %542 = vmatpush2.bf16.msra.mxu0 %v1324_v16  ;;  %1271 = vmatpush2.bf16.msra.mxu1 %v1324_v16 }
  0x3c   : > { %544 = vmatmul.mubr.bf16.vlgmr.msra.gmra.mxu0 %v1325_v17  ;;  %608 = vmatmul.mubr.bf16.vlgmr.msra.gmra.mxu1 %v1328_v18 }
  0x3d   : > { %1069 = vmatprep.mubr.msk.bf16.mxu0 %vm455_vm0, %v1331_v19  ;;  %1077 = vmatprep.mubr.msk.bf16.mxu1 %vm455_vm0, %v1333_v20 }
  0x44   : > { %552 = vmatmul.mubr.bf16.gmra.mxu0 %v1335_v21  ;;  %616 = vmatmul.mubr.bf16.gmra.mxu1 %v1336_v22 }
  0x45   : > { %1070 = vmatprep.mubr.msk.bf16.mxu0 %vm455_vm0, %v1337_v23  ;;  %1078 = vmatprep.mubr.msk.bf16.mxu1 %vm455_vm0, %v1339_v24 }
  0x4c   : > { %560 = vmatmul.mubr.bf16.gmra.mxu0 %v1341_v25  ;;  %624 = vmatmul.mubr.bf16.gmra.mxu1 %v1342_v26 }
  0x4d   : > { %1071 = vmatprep.mubr.msk.bf16.mxu0 %vm455_vm0, %v1343_v27  ;;  %1079 = vmatprep.mubr.msk.bf16.mxu1 %vm455_vm0, %v1345_v28 }
  0x54   : > { %568 = vmatmul.mubr.bf16.gmra.mxu0 %v1347_v29  ;;  %632 = vmatmul.mubr.bf16.gmra.mxu1 %v1348_v30 }
  0x55   : > { %1072 = vmatprep.mubr.msk.bf16.mxu0 %vm455_vm0, %v1349_v31  ;;  %1080 = vmatprep.mubr.msk.bf16.mxu1 %vm455_vm0, %v1351_v32 }
  0x5c   : > { %576 = vmatmul.mubr.bf16.gmra.mxu0 %v1353_v33  ;;  %640 = vmatmul.mubr.bf16.gmra.mxu1 %v1354_v34 }
  0x5d   : > { %1073 = vmatprep.mubr.msk.bf16.mxu0 %vm455_vm0, %v1355_v35  ;;  %1081 = vmatprep.mubr.msk.bf16.mxu1 %vm455_vm0, %v1357_v36 }
  0x64   : > { %584 = vmatmul.mubr.bf16.gmra.mxu0 %v1359_v37  ;;  %648 = vmatmul.mubr.bf16.gmra.mxu1 %v1360_v38 }
  0x65   : > { %1074 = vmatprep.mubr.msk.bf16.mxu0 %vm455_vm0, %v1361_v39  ;;  %1082 = vmatprep.mubr.msk.bf16.mxu1 %vm455_vm0, %v1363_v40 }
  0x6c   : > { %592 = vmatmul.mubr.bf16.gmra.mxu0 %v1365_v41  ;;  %656 = vmatmul.mubr.bf16.gmra.mxu1 %v1366_v42 }
  0x6d   : > { %1075 = vmatprep.mubr.msk.bf16.mxu0 %vm455_vm0, %v1367_v43  ;;  %1083 = vmatprep.mubr.msk.bf16.mxu1 %vm455_vm0, %v1369_v44 }
  0x74   : > { %600 = vmatmul.mubr.bf16.gmra.mxu0 %v1371_v45  ;;  %664 = vmatmul.mubr.bf16.gmra.mxu1 %v1372_v46 }
  0xfc   : > { %v545_v48 = vpop.f32.mrf.mxu0  ;;  %v609_v49 = vpop.f32.mrf.mxu1 }
  0xfd   : > { %v679_v50 = vmul.f32 %v1600_v47, %v545_v48  ;;  %v695_v52 = vmul.f32 %v1600_v47, %v609_v49 }
  0xfe   : > { %v547_v53 = vpop.f32.mrf.mxu0  ;;  %v611_v54 = vpop.f32.mrf.mxu1 }
  0xff   : > { %v718_v55 = vadd.f32 %v1606_v51, %v679_v50  ;;  %v734_v56 = vadd.f32 %v1606_v51, %v695_v52 }
 0x100   : > { %v548_v57 = vpop.f32.mrf.mxu0  ;;  %v612_v58 = vpop.f32.mrf.mxu1 }
 0x101   : > { %v680_v59 = vmul.f32 %v1600_v47, %v548_v57  ;;  %v696_v60 = vmul.f32 %v1600_v47, %v612_v58  ;;  %v750_v1 = vmax.f32 %v718_v55, 0.0  ;;  %v766_v2 = vmax.f32 %v734_v56, 0.0 }
 0x102   : > { %v550_v61 = vpop.f32.mrf.mxu0  ;;  %v614_v62 = vpop.f32.mrf.mxu1 }
 0x103   : > { %v719_v63 = vadd.f32 %v1606_v51, %v680_v59  ;;  %v735_v0 = vadd.f32 %v1606_v51, %v696_v60 }
 0x104   : > { %v553_v3 = vpop.f32.mrf.mxu0  ;;  %v617_v4 = vpop.f32.mrf.mxu1 }
 0x105   : > { %v751_v5 = vmax.f32 %v719_v63, 0.0  ;;  %v767_v6 = vmax.f32 %v735_v0, 0.0  ;;  %v681_v7 = vmul.f32 %v1600_v47, %v553_v3  ;;  %v697_v8 = vmul.f32 %v1600_v47, %v617_v4 }
 0x106   : > { %v555_v9 = vpop.f32.mrf.mxu0  ;;  %v619_v10 = vpop.f32.mrf.mxu1 }
 0x107   : > { %v1160_v11 = vpack.c.bf16 %v751_v5, %v750_v1  ;;  %v1200_v12 = vpack.c.bf16 %v767_v6, %v766_v2  ;;  %v720_v13 = vadd.f32 %v1606_v51, %v681_v7  ;;  %v736_v14 = vadd.f32 %v1606_v51, %v697_v8 }
 0x108   : > { %v556_v15 = vpop.f32.mrf.mxu0  ;;  %v620_v16 = vpop.f32.mrf.mxu1 }
 0x109   : > { %1161 = vst [vmem:[%s1622_s20] sm:$0xff] %v1160_v11   ;;  %1244 = vst [vmem:[%s1622_s20 + $0x40] sm:$0xff] %v1200_v12   ;;  %v682_v17 = vmul.f32 %v1600_v47, %v556_v15  ;;  %v698_v18 = vmul.f32 %v1600_v47, %v620_v16  ;;  %v752_v23 = vmax.f32 %v720_v13, 0.0  ;;  %v768_v24 = vmax.f32 %v736_v14, 0.0 }
 0x10a   : > { %v558_v19 = vpop.f32.mrf.mxu0  ;;  %v622_v20 = vpop.f32.mrf.mxu1 }
 0x10b   : > { %v721_v21 = vadd.f32 %v1606_v51, %v682_v17  ;;  %v737_v22 = vadd.f32 %v1606_v51, %v698_v18 }
 0x10c   : > { %v561_v25 = vpop.f32.mrf.mxu0  ;;  %v625_v26 = vpop.f32.mrf.mxu1 }
 0x10d   : > { %v753_v27 = vmax.f32 %v721_v21, 0.0  ;;  %v769_v28 = vmax.f32 %v737_v22, 0.0  ;;  %v683_v29 = vmul.f32 %v1600_v47, %v561_v25  ;;  %v699_v30 = vmul.f32 %v1600_v47, %v625_v26 }
 0x10e   : > { %v563_v31 = vpop.f32.mrf.mxu0  ;;  %v627_v32 = vpop.f32.mrf.mxu1 }
 0x10f   : > { %v1165_v33 = vpack.c.bf16 %v753_v27, %v752_v23  ;;  %v1205_v34 = vpack.c.bf16 %v769_v28, %v768_v24  ;;  %v722_v35 = vadd.f32 %v1606_v51, %v683_v29  ;;  %v738_v36 = vadd.f32 %v1606_v51, %v699_v30 }
 0x110   : > { %v564_v37 = vpop.f32.mrf.mxu0  ;;  %v628_v38 = vpop.f32.mrf.mxu1 }
 0x111   : > { %1237 = vst [vmem:[%s1622_s20 + $0x8] sm:$0xff] %v1165_v33   ;;  %1245 = vst [vmem:[%s1622_s20 + $0x48] sm:$0xff] %v1205_v34   ;;  %v684_v39 = vmul.f32 %v1600_v47, %v564_v37  ;;  %v700_v40 = vmul.f32 %v1600_v47, %v628_v38  ;;  %v754_v45 = vmax.f32 %v722_v35, 0.0  ;;  %v770_v46 = vmax.f32 %v738_v36, 0.0 }
 0x112   : > { %v566_v41 = vpop.f32.mrf.mxu0  ;;  %v630_v42 = vpop.f32.mrf.mxu1 }
 0x113   : > { %v723_v43 = vadd.f32 %v1606_v51, %v684_v39  ;;  %v739_v44 = vadd.f32 %v1606_v51, %v700_v40 }
 0x114   : > { %v569_v48 = vpop.f32.mrf.mxu0  ;;  %v633_v49 = vpop.f32.mrf.mxu1 }
 0x115   : > { %v755_v50 = vmax.f32 %v723_v43, 0.0  ;;  %v771_v52 = vmax.f32 %v739_v44, 0.0  ;;  %v685_v53 = vmul.f32 %v1600_v47, %v569_v48  ;;  %v701_v54 = vmul.f32 %v1600_v47, %v633_v49 }
 0x116   : > { %v571_v55 = vpop.f32.mrf.mxu0  ;;  %v635_v56 = vpop.f32.mrf.mxu1 }
 0x117   : > { %v1170_v57 = vpack.c.bf16 %v755_v50, %v754_v45  ;;  %v1210_v58 = vpack.c.bf16 %v771_v52, %v770_v46  ;;  %v724_v59 = vadd.f32 %v1606_v51, %v685_v53  ;;  %v740_v60 = vadd.f32 %v1606_v51, %v701_v54 }
 0x118   : > { %v572_v61 = vpop.f32.mrf.mxu0  ;;  %v636_v62 = vpop.f32.mrf.mxu1 }
 0x119   : > { %1238 = vst [vmem:[%s1622_s20 + $0x10] sm:$0xff] %v1170_v57   ;;  %1246 = vst [vmem:[%s1622_s20 + $0x50] sm:$0xff] %v1210_v58   ;;  %v686_v63 = vmul.f32 %v1600_v47, %v572_v61  ;;  %v702_v0 = vmul.f32 %v1600_v47, %v636_v62  ;;  %v756_v5 = vmax.f32 %v724_v59, 0.0  ;;  %v772_v6 = vmax.f32 %v740_v60, 0.0 }
 0x11a   : > { %v574_v1 = vpop.f32.mrf.mxu0  ;;  %v638_v2 = vpop.f32.mrf.mxu1 }
 0x11b   : > { %v725_v3 = vadd.f32 %v1606_v51, %v686_v63  ;;  %v741_v4 = vadd.f32 %v1606_v51, %v702_v0 }
 0x11c   : > { %v577_v7 = vpop.f32.mrf.mxu0  ;;  %v641_v8 = vpop.f32.mrf.mxu1 }
 0x11d   : > { %v757_v9 = vmax.f32 %v725_v3, 0.0  ;;  %v773_v10 = vmax.f32 %v741_v4, 0.0  ;;  %v687_v11 = vmul.f32 %v1600_v47, %v577_v7  ;;  %v703_v12 = vmul.f32 %v1600_v47, %v641_v8 }
 0x11e   : > { %v579_v13 = vpop.f32.mrf.mxu0  ;;  %v643_v14 = vpop.f32.mrf.mxu1 }
 0x11f   : > { %v1175_v15 = vpack.c.bf16 %v757_v9, %v756_v5  ;;  %v1215_v16 = vpack.c.bf16 %v773_v10, %v772_v6  ;;  %v726_v17 = vadd.f32 %v1606_v51, %v687_v11  ;;  %v742_v18 = vadd.f32 %v1606_v51, %v703_v12 }
 0x120   : > { %v580_v19 = vpop.f32.mrf.mxu0  ;;  %v644_v20 = vpop.f32.mrf.mxu1 }
 0x121   : > { %1239 = vst [vmem:[%s1622_s20 + $0x18] sm:$0xff] %v1175_v15   ;;  %1247 = vst [vmem:[%s1622_s20 + $0x58] sm:$0xff] %v1215_v16   ;;  %v688_v21 = vmul.f32 %v1600_v47, %v580_v19  ;;  %v704_v22 = vmul.f32 %v1600_v47, %v644_v20  ;;  %v758_v27 = vmax.f32 %v726_v17, 0.0  ;;  %v774_v28 = vmax.f32 %v742_v18, 0.0 }
 0x122   : > { %v582_v23 = vpop.f32.mrf.mxu0  ;;  %v646_v24 = vpop.f32.mrf.mxu1 }
 0x123   : > { %v727_v25 = vadd.f32 %v1606_v51, %v688_v21  ;;  %v743_v26 = vadd.f32 %v1606_v51, %v704_v22 }
 0x124   : > { %v585_v29 = vpop.f32.mrf.mxu0  ;;  %v649_v30 = vpop.f32.mrf.mxu1 }
 0x125   : > { %v759_v31 = vmax.f32 %v727_v25, 0.0  ;;  %v775_v32 = vmax.f32 %v743_v26, 0.0  ;;  %v689_v33 = vmul.f32 %v1600_v47, %v585_v29  ;;  %v705_v34 = vmul.f32 %v1600_v47, %v649_v30 }
 0x126   : > { %v587_v35 = vpop.f32.mrf.mxu0  ;;  %v651_v36 = vpop.f32.mrf.mxu1 }
 0x127   : > { %v1180_v37 = vpack.c.bf16 %v759_v31, %v758_v27  ;;  %v1220_v38 = vpack.c.bf16 %v775_v32, %v774_v28  ;;  %v728_v39 = vadd.f32 %v1606_v51, %v689_v33  ;;  %v744_v40 = vadd.f32 %v1606_v51, %v705_v34 }
 0x128   : > { %v588_v41 = vpop.f32.mrf.mxu0  ;;  %v652_v42 = vpop.f32.mrf.mxu1 }
 0x129   : > { %1240 = vst [vmem:[%s1622_s20 + $0x20] sm:$0xff] %v1180_v37   ;;  %1248 = vst [vmem:[%s1622_s20 + $0x60] sm:$0xff] %v1220_v38   ;;  %v690_v43 = vmul.f32 %v1600_v47, %v588_v41  ;;  %v706_v44 = vmul.f32 %v1600_v47, %v652_v42  ;;  %v760_v50 = vmax.f32 %v728_v39, 0.0  ;;  %v776_v52 = vmax.f32 %v744_v40, 0.0 }
 0x12a   : > { %v590_v45 = vpop.f32.mrf.mxu0  ;;  %v654_v46 = vpop.f32.mrf.mxu1 }
 0x12b   : > { %v729_v48 = vadd.f32 %v1606_v51, %v690_v43  ;;  %v745_v49 = vadd.f32 %v1606_v51, %v706_v44 }
 0x12c   : > { %v593_v53 = vpop.f32.mrf.mxu0  ;;  %v657_v54 = vpop.f32.mrf.mxu1 }
 0x12d   : > { %v761_v55 = vmax.f32 %v729_v48, 0.0  ;;  %v777_v56 = vmax.f32 %v745_v49, 0.0  ;;  %v691_v57 = vmul.f32 %v1600_v47, %v593_v53  ;;  %v707_v58 = vmul.f32 %v1600_v47, %v657_v54 }
 0x12e   : > { %v595_v59 = vpop.f32.mrf.mxu0  ;;  %v659_v60 = vpop.f32.mrf.mxu1 }
 0x12f   : > { %v1185_v61 = vpack.c.bf16 %v761_v55, %v760_v50  ;;  %v1225_v62 = vpack.c.bf16 %v777_v56, %v776_v52  ;;  %v730_v63 = vadd.f32 %v1606_v51, %v691_v57  ;;  %v746_v0 = vadd.f32 %v1606_v51, %v707_v58 }
 0x130   : > { %v596_v1 = vpop.f32.mrf.mxu0  ;;  %v660_v2 = vpop.f32.mrf.mxu1 }
 0x131   : > { %1241 = vst [vmem:[%s1622_s20 + $0x28] sm:$0xff] %v1185_v61   ;;  %1249 = vst [vmem:[%s1622_s20 + $0x68] sm:$0xff] %v1225_v62   ;;  %v692_v3 = vmul.f32 %v1600_v47, %v596_v1  ;;  %v708_v4 = vmul.f32 %v1600_v47, %v660_v2  ;;  %v762_v9 = vmax.f32 %v730_v63, 0.0  ;;  %v778_v10 = vmax.f32 %v746_v0, 0.0 }
 0x132   : > { %v598_v5 = vpop.f32.mrf.mxu0  ;;  %v662_v6 = vpop.f32.mrf.mxu1 }
 0x133   : > { %v731_v7 = vadd.f32 %v1606_v51, %v692_v3  ;;  %v747_v8 = vadd.f32 %v1606_v51, %v708_v4 }
 0x134   : > { %v601_v11 = vpop.f32.mrf.mxu0  ;;  %v665_v12 = vpop.f32.mrf.mxu1 }
 0x135   : > { %v763_v13 = vmax.f32 %v731_v7, 0.0  ;;  %v779_v14 = vmax.f32 %v747_v8, 0.0  ;;  %v693_v15 = vmul.f32 %v1600_v47, %v601_v11  ;;  %v709_v16 = vmul.f32 %v1600_v47, %v665_v12 }
 0x136   : > { %v603_v17 = vpop.f32.mrf.mxu0  ;;  %v667_v18 = vpop.f32.mrf.mxu1 }
 0x137   : > { %v1190_v19 = vpack.c.bf16 %v763_v13, %v762_v9  ;;  %v1230_v20 = vpack.c.bf16 %v779_v14, %v778_v10  ;;  %v732_v23 = vadd.f32 %v1606_v51, %v693_v15  ;;  %v748_v24 = vadd.f32 %v1606_v51, %v709_v16 }
 0x138   : > { %v604_v21 = vpop.f32.mrf.mxu0  ;;  %v668_v22 = vpop.f32.mrf.mxu1 }
 0x139   : > { %1242 = vst [vmem:[%s1622_s20 + $0x30] sm:$0xff] %v1190_v19   ;;  %1250 = vst [vmem:[%s1622_s20 + $0x70] sm:$0xff] %v1230_v20   ;;  %v694_v25 = vmul.f32 %v1600_v47, %v604_v21  ;;  %v710_v26 = vmul.f32 %v1600_v47, %v668_v22  ;;  %v764_v31 = vmax.f32 %v732_v23, 0.0  ;;  %v780_v32 = vmax.f32 %v748_v24, 0.0 }
 0x13a   : > { %v606_v27 = vpop.f32.mrf.mxu0  ;;  %v670_v28 = vpop.f32.mrf.mxu1 }
 0x13b   : > { %v733_v29 = vadd.f32 %v1606_v51, %v694_v25  ;;  %v749_v30 = vadd.f32 %v1606_v51, %v710_v26 }
 0x13d   : > { %v765_v33 = vmax.f32 %v733_v29, 0.0  ;;  %v781_v34 = vmax.f32 %v749_v30, 0.0 }
 0x13f   : > { %v1195_v47 = vpack.c.bf16 %v765_v33, %v764_v31  ;;  %v1235_v35 = vpack.c.bf16 %v781_v34, %v780_v32 }
 0x141   : > { %1243 = vst [vmem:[%s1622_s20 + $0x38] sm:$0xff] %v1195_v47   ;;  %1251 = vst [vmem:[%s1622_s20 + $0x78] sm:$0xff] %v1235_v35  }
 0x142   : > { %1386 = shalt.err (!%p1383_p3)
}
 0x143   : > { %s1387_s8 = scalar_lea.hbm %s1695_s29, 2048  ;;  %s1391_s11 = scalar_lea.hbm %s1747_s4, 4096 }
 0x144   : > { %p1388_p4 = scmp.ne.s32.totalorder %s1695_s29, %s1387_s8  ;;  %p1392_p9 = scmp.lt.s32.totalorder %s1695_s29, %s1747_s4 }
 0x145   : > { %p1393_p10 = scmp.lt.s32.totalorder %s1391_s11, %s1387_s8 }
 0x146   : > { %p1389_p7 = pnand %p1388_p4, %p1503_p5 }
 0x147   : > { %p1394_p11 = por %p1393_p10, %p1392_p9 }
 0x148   : > { %p1390_p8 = pneg %p1389_p7 }
 0x14a   : > { %p1395_p12 = pnand %p1394_p11, %p1390_p8 }
 0x14c   : > { %1398 = shalt.err (!%p1395_p12)
}
 0x14d   : > { %s1438_s14 = smov 64   ;;  %s1439_s20 = smov 4  }
 0x14e   : > { %1272 = dma.vmem_to_hbm [thread:$0]  (%p1503_p5), %s1697_s23, 2048, %s1695_s29, %s1703_s19, %s1438_s14, %s1438_s14, %s1439_s20  }
 0x14f PF: > { %p1278_p13 = scmp.ge.s32.totalorder %s1433_s18, 2  ;;  %s971_s22 = sand.u32 1, %s1421_s15  }
 0x150   : > { %s972_s27 = scalar_lea.sflag [#allocation3], %s971_s22 }
 0x151   : > { %p1275_p0 = pnand %p1278_p13, %p1507_p6 }
 0x153   : > { %p1276_p1 = pneg %p1275_p0 }
 0x155   : > { %1416 = dma.done.wait (%p1276_p1), %s972_s27, 2048  }
 0x156   : > { %1418 = vsyncadd (%p1276_p1), %s972_s27, 4294965248  ;;  %p14_p2 = scmp.ge.s32.totalorder %s1490_s21, 4   ;;  %s1750_s15 = smov %s1425_s16 }
 0x157   : > { %s1751_s16 = smov %s1429_s17  ;;  %s1752_s17 = smov %s1501_s24 }
 0x158   : > { %s1753_s18 = smov %s1490_s21  ;;  %16 = sbr.rel (!%p14_p2) target bundleno = 3 (0x3), region = 71 }
 0x15d   :  { %977 = vsyncpa [#allocation3], 1 }
 0x15e   :  { %979 = vsyncpa [#allocation3 + $0x1], 1 }

</bundles_post_ra>
